<compile_context>
chip_gen: v7x
topology: tpu7x:2x2x1
jax: 0.10.0
libtpu: 0.0.40
codegen_flags: <defaults>
</compile_context>

<pallas_src>
import math

import jax
import jax.numpy as jnp
from jax.experimental import pallas as pl
from jax.experimental.pallas import tpu as pltpu


def _ru(x, m):
    return (x + m - 1) // m * m


# ----------------------------------------------------------------------------
# kernel: one fused read-compute-write per block
# ----------------------------------------------------------------------------
def _h_sigmoid_kernel(x_ref, o_ref):
    x = x_ref[...]
    # relu6(x + 3) / 6  ==  clip(x + 3, 0, 6) * (1/6)
    o_ref[...] = (jnp.clip(x + 3.0, 0.0, 6.0) * (1.0 / 6.0)).astype(o_ref.dtype)


# ----------------------------------------------------------------------------
# flat, 128-aligned path: lane-dense 2D view, ~4 MiB blocks, cdiv grid
# ----------------------------------------------------------------------------
def _h_sigmoid_aligned(flat):
    """flat: 1-D array whose length is a multiple of 128."""
    n = flat.shape[0]
    itemsize = jnp.dtype(flat.dtype).itemsize

    # Lane width: largest power-of-two multiple of 128 dividing n (keeps the
    # reshape a free view of contiguous memory, stores fully lane-dense).
    for c in (2048, 1024, 512, 256, 128):
        if n % c == 0:
            C = c
            break
    R = n // C
    x2 = flat.reshape(R, C)

    # Sublane packing per dtype: f32 -> 8, bf16/f16 -> 16, int8/fp8 -> 32.
    pack = max(8, 32 // itemsize)

    # ~4 MiB per block buffer (rounded to the packed sublane multiple).
    budget_rows = max(pack, ((4 << 20) // (C * itemsize)) // pack * pack)

    total_bytes = n * itemsize
    if total_bytes <= (2 << 20) or R <= pack:
        # Small array: one block, full-extent rows (always a legal block dim).
        tm = R
    else:
        # At least 8 grid steps (shards across both TCs on v7x), blocks capped
        # at the ~4 MiB budget.  Non-divisible R is handled by the cdiv grid:
        # the last block is partial and masked on writeback.
        n_blocks = max(8, pl.cdiv(R, budget_rows))
        tm = _ru(pl.cdiv(R, n_blocks), pack)

    grid = pl.cdiv(R, tm)

    out = pl.pallas_call(
        _h_sigmoid_kernel,
        out_shape=jax.ShapeDtypeStruct((R, C), flat.dtype),
        grid_spec=pl.GridSpec(
            grid=(grid,),
            in_specs=[pl.BlockSpec((tm, C), lambda i: (i, 0))],
            out_specs=pl.BlockSpec((tm, C), lambda i: (i, 0)),
        ),
        compiler_params=pltpu.CompilerParams(
            dimension_semantics=("parallel",),
            vmem_limit_bytes=48 * 1024 * 1024,
        ),
    )(x2)
    return out.reshape(-1)


def h_sigmoid(x):
    """Elementwise hard-sigmoid, any shape / float dtype, via a Pallas kernel."""
    shape = x.shape
    n = int(math.prod(shape)) if shape else 1
    if n == 0:
        return x

    flat = x.reshape(-1)
    rem = n % 128
    n_main = n - rem

    if rem == 0:
        out_flat = _h_sigmoid_aligned(flat)
    elif n_main == 0:
        # Tiny (<128 elements) tensor: plain jnp, no kernel needed.
        out_flat = (jnp.clip(flat + 3.0, 0.0, 6.0) * (1.0 / 6.0)).astype(x.dtype)
    else:
        # Lane-ragged: kernel on the 128-aligned prefix, jnp on the tiny tail.
        head = _h_sigmoid_aligned(flat[:n_main])
        tail = (jnp.clip(flat[n_main:] + 3.0, 0.0, 6.0) * (1.0 / 6.0)).astype(x.dtype)
        out_flat = jnp.concatenate([head, tail])

    return out_flat.reshape(shape)


def _h_sigmoid_ref(x):
    return jnp.clip(x + 3.0, 0.0, 6.0) / 6.0


# ----------------------------------------------------------------------------
if __name__ == "__main__":
    key = jax.random.PRNGKey(0)
    fwd = jax.jit(h_sigmoid)

    # primary test: small NCHW-style tensor (elementwise activation on feature maps)
    x = jax.random.normal(key, (2, 4, 16, 16), jnp.float32) * 4.0
    y = jax.block_until_ready(fwd(x))
    assert y.shape == x.shape
    assert jnp.allclose(y, _h_sigmoid_ref(x), atol=1e-6, rtol=1e-6)

    # larger, multi-block case (exercises the big-tile cdiv-grid path)
    x2 = jax.random.normal(jax.random.fold_in(key, 1), (4, 32, 128, 128),
                           jnp.float32) * 4.0
    y2 = jax.block_until_ready(fwd(x2))
    assert jnp.allclose(y2, _h_sigmoid_ref(x2), atol=1e-6, rtol=1e-6)

    # ragged sizes (tiny-tensor and prefix+tail paths)
    x3 = jax.random.normal(jax.random.fold_in(key, 2), (3, 5, 7),
                           jnp.float32) * 4.0
    y3 = jax.block_until_ready(fwd(x3))
    assert jnp.allclose(y3, _h_sigmoid_ref(x3), atol=1e-6, rtol=1e-6)

    x4 = jax.random.normal(jax.random.fold_in(key, 3), (3, 130),
                           jnp.float32) * 4.0
    y4 = jax.block_until_ready(fwd(x4))
    assert jnp.allclose(y4, _h_sigmoid_ref(x4), atol=1e-6, rtol=1e-6)

    # bf16 case (exercises dtype-aware sublane rounding)
    x5 = (jax.random.normal(jax.random.fold_in(key, 4), (2, 8, 128),
                            jnp.float32) * 4.0).astype(jnp.bfloat16)
    y5 = jax.block_until_ready(fwd(x5))
    assert y5.dtype == jnp.bfloat16
    assert jnp.allclose(y5.astype(jnp.float32),
                        _h_sigmoid_ref(x5).astype(jnp.float32),
                        atol=1e-2, rtol=1e-2)

    assert bool(jnp.all(jnp.isfinite(y)))
    print("KERNEL_OK")
</pallas_src>

<mosaic_0001>
module attributes {stable_mosaic.version = 11 : i64} {
  func.func @_h_sigmoid_kernel(%arg0: i32, %arg1: memref<1x2048xf32, #tpu.memory_space<vmem>>, %arg2: memref<1x2048xf32, #tpu.memory_space<vmem>>) attributes {dimension_semantics = [#tpu.dimension_semantics<parallel>], iteration_bounds = array<i64: 1>, scalar_prefetch = 0 : i64, scratch_operands = 0 : i64, tpu.core_type = #tpu.core_type<tc>, window_params = [{transform_indices = @transform_0, window_bounds = array<i64: 1, 2048>}, {transform_indices = @transform_1, window_bounds = array<i64: 1, 2048>}]} {
    %c0 = arith.constant 0 : index
    %c0_0 = arith.constant 0 : index
    %0 = vector.load %arg1[%c0, %c0_0] : memref<1x2048xf32, #tpu.memory_space<vmem>>, vector<1x2048xf32>
    %cst = arith.constant 3.000000e+00 : f32
    %1 = vector.broadcast %cst : f32 to vector<1x2048xf32>
    %2 = arith.addf %0, %1 : vector<1x2048xf32>
    %cst_1 = arith.constant 0.000000e+00 : f32
    %cst_2 = arith.constant 6.000000e+00 : f32
    %3 = vector.broadcast %cst_1 : f32 to vector<1x2048xf32>
    %4 = arith.maximumf %3, %2 : vector<1x2048xf32>
    %5 = vector.broadcast %cst_2 : f32 to vector<1x2048xf32>
    %6 = arith.minimumf %5, %4 : vector<1x2048xf32>
    %cst_3 = arith.constant 0.166666672 : f32
    %7 = vector.broadcast %cst_3 : f32 to vector<1x2048xf32>
    %8 = arith.mulf %6, %7 : vector<1x2048xf32>
    %c0_4 = arith.constant 0 : index
    %c0_5 = arith.constant 0 : index
    %9 = vector.load %arg2[%c0_4, %c0_5] : memref<1x2048xf32, #tpu.memory_space<vmem>>, vector<1x2048xf32>
    tpu.vector_store %arg2[%c0_4, %c0_5], %8 {strides = array<i32>} : memref<1x2048xf32, #tpu.memory_space<vmem>>, vector<1x2048xf32>,
    return
  }
  func.func @transform_0(%arg0: i32) -> (i32, i32) {
    %c0_i32 = arith.constant 0 : i32
    %c0_i32_0 = arith.constant 0 : i32
    return %arg0, %c0_i32 : i32, i32
  }
  func.func @transform_1(%arg0: i32) -> (i32, i32) {
    %c0_i32 = arith.constant 0 : i32
    %c0_i32_0 = arith.constant 0 : i32
    return %arg0, %c0_i32 : i32, i32
  }
}

</mosaic_0001>

<bundles_post_ra>
// kernel: h_sigmoid.1
= control target key start
LH: loop header
LB: loop body
LE: loop exit
PB: predicated region body
PF: predicated region fallthrough
CT: control target
= control target key end

     0   :  { %s46_s0 = inlined_call_operand.vmem [shape: f32[1,2048], index: 0, kind: input, shape index: {}]   ;;  %s47_s1 = inlined_call_operand.vmem [shape: f32[1,2048], index: 1, kind: output, shape index: {}]  }
   0x1   :  { %v8_v0 = vld [vmem:[%s46_s0] sm:$0xff]  ;;  %v9_v1 = vld [vmem:[%s46_s0 + $0x8] sm:$0xff] }
   0x2   :  { %v10_v2 = vadd.f32 3.0, %v8_v0  ;;  %v11_v3 = vadd.f32 3.0, %v9_v1 }
   0x4   :  { %v12_v4 = vmax.f32 %v10_v2, 0.0  ;;  %v13_v5 = vmax.f32 %v11_v3, 0.0 }
   0x6   :  { %v14_v6 = vmin.f32 %v12_v4, 6.0  ;;  %v15_v7 = vmin.f32 %v13_v5, 6.0 }
   0x8   :  { %v16_v8 = vmul.f32 0.16666667, %v14_v6  ;;  %v17_v9 = vmul.f32 0.16666667, %v15_v7 }
   0xa   :  { %18 = vst [vmem:[%s47_s1] sm:$0xff] %v16_v8  ;;  %19 = vst [vmem:[%s47_s1 + $0x8] sm:$0xff] %v17_v9 }

</bundles_post_ra>
